<compile_context>
chip_gen: v7x
topology: tpu7x:2x2x1
jax: 0.10.0
libtpu: 0.0.40
codegen_flags: <defaults>
</compile_context>

<pallas_src>
import functools

import jax
import jax.numpy as jnp
from jax import lax
from jax.experimental import pallas as pl
from jax.experimental.pallas import tpu as pltpu

N_HEADS = 4
LANES = 128

ENC_KEYS = ("wq", "bq", "wk", "bk", "wv", "bv", "wo", "bo",
            "g1", "be1", "w1", "b1", "w2", "b2", "g2", "be2")


def _full_spec(a):
    # whole-array block, same tile for every grid step
    n = a.ndim
    return pl.BlockSpec(a.shape, lambda i, n=n: (0,) * n)


def _layer_norm(y, g, b):
    mu = jnp.mean(y, axis=-1, keepdims=True)
    var = jnp.mean((y - mu) ** 2, axis=-1, keepdims=True)
    return (y - mu) * lax.rsqrt(var + 1e-5) * g + b


# --------------------------------------------------------------------------------------
# Production kernel: logits = classifier(mean(x, dim=1)).  Two small MXU matmuls.
# --------------------------------------------------------------------------------------
def _logits_kernel(x_ref, pool_ref, wc_ref, bc_ref, out_ref):
    m = jnp.dot(pool_ref[...], x_ref[...], preferred_element_type=jnp.float32)   # (B, D)
    out_ref[...] = (jnp.dot(m, wc_ref[...], preferred_element_type=jnp.float32)
                    + bc_ref[...])                                               # (B, 128)


# --------------------------------------------------------------------------------------
# Optional encoder kernel (output is discarded in the original forward; verification only)
# --------------------------------------------------------------------------------------
def _make_encoder_kernel(B, S, D, n_layers, n_heads):
    dh = D // n_heads
    scale = 1.0 / float(dh) ** 0.5

    def kernel(x_ref, bias_ref, seg_ref, hsub_ref,
               wq_ref, bq_ref, wk_ref, bk_ref, wv_ref, bv_ref, wo_ref, bo_ref,
               g1_ref, be1_ref, w1_ref, b1_ref, w2_ref, b2_ref, g2_ref, be2_ref,
               enc_ref):
        h = x_ref[...]                       # (B*S, D), rows = (b, s) row-major
        bias = bias_ref[...]                 # (B*S, H*B*S) additive same-seq mask
        seg = seg_ref[...]                   # (H*B*S, H*B*S) block-diagonal ones
        hsub = hsub_ref[...]                 # (H*B*S, D) head-selection mask

        for l in range(n_layers):            # unrolled: n_layers is static & small
            q = (jnp.dot(h, wq_ref[l], preferred_element_type=jnp.float32)
                 + bq_ref[l]) * scale
            k = jnp.dot(h, wk_ref[l], preferred_element_type=jnp.float32) + bk_ref[l]
            v = jnp.dot(h, wv_ref[l], preferred_element_type=jnp.float32) + bv_ref[l]

            # sublane-replicate K/V once per head; zero the out-of-head feature columns.
            k_b = jnp.concatenate([k] * n_heads, axis=0) * hsub      # (H*BS, D)
            v_b = jnp.concatenate([v] * n_heads, axis=0) * hsub      # (H*BS, D)

            # all-head scores in ONE lane-dense matmul: (BS, D) x (H*BS, D)^T -> (BS, H*BS)
            s = lax.dot_general(q, k_b, (((1,), (1,)), ((), ())),
                                preferred_element_type=jnp.float32) + bias
            s = s - jnp.max(s, axis=-1, keepdims=True)   # shared row shift, valid per head
            p = jnp.exp(s)
            # per-head softmax denominators broadcast back via one block-diagonal matmul
            denom = jnp.dot(p, seg, preferred_element_type=jnp.float32)
            p = p * pl.reciprocal(denom, approx=True)

            # context + output projection fused: rows of vwo are V_h[j] @ Wo_h
            vwo = jnp.dot(v_b, wo_ref[l], preferred_element_type=jnp.float32)   # (H*BS, D)
            attn = jnp.dot(p, vwo, preferred_element_type=jnp.float32) + bo_ref[l]

            h1 = _layer_norm(h + attn, g1_ref[l], be1_ref[l])
            ff = jnp.maximum(
                jnp.dot(h1, w1_ref[l], preferred_element_type=jnp.float32) + b1_ref[l],
                0.0)
            ff = jnp.dot(ff, w2_ref[l], preferred_element_type=jnp.float32) + b2_ref[l]
            h = _layer_norm(h1 + ff, g2_ref[l], be2_ref[l])

        enc_ref[...] = h

    return kernel


# --------------------------------------------------------------------------------------
# Full forward (preprocessing glue in plain JAX, all compute in Pallas kernels)
# --------------------------------------------------------------------------------------
def classifier_forward(x_emb, params, wc, bc, *, compute_encoder=False):
    # TODO(synk): VQVAE.encode is a frozen pretrained model loaded from checkpoint; it has
    # no clean in-script equivalent, so x_emb stands in for its embedding output.
    B, E, T, H, W = x_emb.shape
    x = x_emb.reshape(B, E, T, H * W)          # torch.flatten(start_dim=3, end_dim=4)
    x = x.reshape(B, E * T, H * W)             # torch.flatten(start_dim=1, end_dim=2)
    x = jnp.moveaxis(x, 1, -1)                 # shift_dim(x, 1, -1) -> (B, S=H*W, D=E*T)
    Bx, S, D = x.shape
    C = wc.shape[1]
    x2d = x.reshape(Bx * S, D)                 # row r = b*S + s (free reshape)

    # ---- production path: logits only (the encoder never feeds them in the original) ----
    pool = ((jnp.arange(Bx * S)[None, :] // S) == jnp.arange(Bx)[:, None]
            ).astype(jnp.float32) * (1.0 / S)                       # (B, B*S) mean as matmul
    cpad = ((C + LANES - 1) // LANES) * LANES                       # lane-dense output slab
    wc_p = jnp.pad(wc.astype(jnp.float32), ((0, 0), (0, cpad - C)))
    bc_p = jnp.pad(bc.astype(jnp.float32), ((0, 0), (0, cpad - C)))

    logits_inputs = (x2d, pool, wc_p, bc_p)
    logits_pad = pl.pallas_call(
        _logits_kernel,
        out_shape=jax.ShapeDtypeStruct((Bx, cpad), jnp.float32),
        grid=(1,),
        in_specs=[_full_spec(a) for a in logits_inputs],
        out_specs=pl.BlockSpec((Bx, cpad), lambda i: (0, 0)),
        compiler_params=pltpu.CompilerParams(dimension_semantics=("arbitrary",)),
    )(*logits_inputs)
    logits = logits_pad[:, :C]

    if not compute_encoder:
        return logits

    # ---- verification-only encoder path ----
    n_layers = params["wq"].shape[0]
    BS = Bx * S
    HBS = N_HEADS * BS
    dh = D // N_HEADS

    # seq-first PyTorch semantics: row b*S+s attends rows b'*S+s (same spatial index s).
    # Precompute the additive mask (tiled per head block), the block-diagonal segment-sum
    # matrix, and the head-selection mask — all static constants, folded by XLA.
    s_idx = jnp.arange(BS) % S
    same = s_idx[:, None] == s_idx[None, :]
    bias = jnp.where(jnp.tile(same, (1, N_HEADS)), 0.0, -1e30).astype(jnp.float32)
    blk = jnp.arange(HBS) // BS                                      # head index per row
    seg = (blk[:, None] == blk[None, :]).astype(jnp.float32)        # (HBS, HBS)
    hsub = ((jnp.arange(D)[None, :] // dh) == blk[:, None]).astype(jnp.float32)  # (HBS, D)

    kernel = _make_encoder_kernel(Bx, S, D, n_layers, N_HEADS)
    enc_inputs = [x2d, bias, seg, hsub] + [params[k] for k in ENC_KEYS]
    enc2d = pl.pallas_call(
        kernel,
        out_shape=jax.ShapeDtypeStruct((BS, D), jnp.float32),
        grid=(1,),
        in_specs=[_full_spec(a) for a in enc_inputs],
        out_specs=pl.BlockSpec((BS, D), lambda i: (0, 0)),
        compiler_params=pltpu.CompilerParams(dimension_semantics=("arbitrary",)),
    )(*enc_inputs)
    return logits, enc2d.reshape(Bx, S, D)


# --------------------------------------------------------------------------------------
# Deterministic parameter init (shapes implied by the module's __init__), stacked by layer
# --------------------------------------------------------------------------------------
def init_params(key, d_model, dff, n_layers, n_classes):
    keys = jax.random.split(key, n_layers * 6 + 1)

    def layer(l):
        k = keys[l * 6:(l + 1) * 6]
        return dict(
            wq=0.02 * jax.random.normal(k[0], (d_model, d_model), jnp.float32),
            bq=jnp.zeros((1, d_model), jnp.float32),
            wk=0.02 * jax.random.normal(k[1], (d_model, d_model), jnp.float32),
            bk=jnp.zeros((1, d_model), jnp.float32),
            wv=0.02 * jax.random.normal(k[2], (d_model, d_model), jnp.float32),
            bv=jnp.zeros((1, d_model), jnp.float32),
            wo=0.02 * jax.random.normal(k[3], (d_model, d_model), jnp.float32),
            bo=jnp.zeros((1, d_model), jnp.float32),
            g1=jnp.ones((1, d_model), jnp.float32),
            be1=jnp.zeros((1, d_model), jnp.float32),
            w1=0.02 * jax.random.normal(k[4], (d_model, dff), jnp.float32),
            b1=jnp.zeros((1, dff), jnp.float32),
            w2=0.02 * jax.random.normal(k[5], (dff, d_model), jnp.float32),
            b2=jnp.zeros((1, d_model), jnp.float32),
            g2=jnp.ones((1, d_model), jnp.float32),
            be2=jnp.zeros((1, d_model), jnp.float32),
        )

    per_layer = [layer(l) for l in range(n_layers)]
    stacked = {k: jnp.stack([p[k] for p in per_layer], axis=0) for k in ENC_KEYS}
    wc = 0.02 * jax.random.normal(keys[-1], (d_model, n_classes), jnp.float32)
    bc = jnp.zeros((1, n_classes), jnp.float32)
    return stacked, wc, bc


# --------------------------------------------------------------------------------------
# Pure-JAX reference (for correctness checks of both kernels)
# --------------------------------------------------------------------------------------
def _encoder_layer_ref(x, p):
    # x: (Nb, L, D) batch-first; attention over L
    D = x.shape[-1]
    dh = D // N_HEADS
    q = x @ p["wq"] + p["bq"][0]
    k = x @ p["wk"] + p["bk"][0]
    v = x @ p["wv"] + p["bv"][0]
    heads = lambda t: t.reshape(t.shape[0], t.shape[1], N_HEADS, dh).transpose(0, 2, 1, 3)
    qh, kh, vh = heads(q), heads(k), heads(v)
    s = jnp.einsum("bhqd,bhkd->bhqk", qh, kh) / (dh ** 0.5)
    a = jax.nn.softmax(s, axis=-1)
    ctx = jnp.einsum("bhqk,bhkd->bhqd", a, vh).transpose(0, 2, 1, 3).reshape(x.shape)
    attn = ctx @ p["wo"] + p["bo"][0]

    def ln(y, g, b):
        mu = y.mean(-1, keepdims=True)
        var = ((y - mu) ** 2).mean(-1, keepdims=True)
        return (y - mu) * jax.lax.rsqrt(var + 1e-5) * g + b

    x1 = ln(x + attn, p["g1"][0], p["be1"][0])
    ff = jnp.maximum(x1 @ p["w1"] + p["b1"][0], 0.0) @ p["w2"] + p["b2"][0]
    return ln(x1 + ff, p["g2"][0], p["be2"][0])


if __name__ == "__main__":
    # latent_shape = (T, H, W) = (2, 4, 4)  =>  size = d_model = 32
    # embedding_dim E = 16 so the flattened feature dim E*T equals `size`.
    B, E, T, H, W = 2, 16, 2, 4, 4
    d_model = T * H * W                 # 32
    dff, n_layers, n_classes = 64, 2, 2

    key = jax.random.PRNGKey(0)
    kx, kp = jax.random.split(key)
    x_emb = jax.random.normal(kx, (B, E, T, H, W), jnp.float32)
    params, wc, bc = init_params(kp, d_model, dff, n_layers, n_classes)

    # production path: logits only (mirrors the original returned value)
    fwd = jax.jit(classifier_forward)
    logits = fwd(x_emb, params, wc, bc)
    jax.block_until_ready(logits)

    # verification path: additionally runs the (discarded-in-original) encoder kernel
    fwd_full = jax.jit(functools.partial(classifier_forward, compute_encoder=True))
    logits_v, enc = fwd_full(x_emb, params, wc, bc)
    jax.block_until_ready((logits_v, enc))

    # pure-JAX reference
    x = jnp.moveaxis(x_emb.reshape(B, E, T, H * W).reshape(B, E * T, H * W), 1, -1)
    logits_ref = x.mean(axis=1) @ wc + bc[0]
    enc_ref = jnp.transpose(x, (1, 0, 2))            # seq-first: (S, B, D) batches of len B
    for l in range(n_layers):
        p_l = {k: params[k][l] for k in ENC_KEYS}
        enc_ref = _encoder_layer_ref(enc_ref, p_l)
    enc_ref = jnp.transpose(enc_ref, (1, 0, 2))      # back to (B, S, D)

    assert logits.shape == (B, n_classes)
    assert jnp.allclose(logits, logits_ref, atol=1e-4, rtol=1e-4), "logits mismatch"
    assert jnp.allclose(logits_v, logits_ref, atol=1e-4, rtol=1e-4), "logits mismatch (verif)"
    assert jnp.allclose(enc, enc_ref, atol=1e-3, rtol=1e-3), "encoder mismatch"
    print("KERNEL_OK")
</pallas_src>

<mosaic_0001>
module attributes {stable_mosaic.version = 11 : i64} {
  func.func @_logits_kernel(%arg0: i32, %arg1: memref<32x32xf32, #tpu.memory_space<vmem>>, %arg2: memref<2x32xf32, #tpu.memory_space<vmem>>, %arg3: memref<32x128xf32, #tpu.memory_space<vmem>>, %arg4: memref<1x128xf32, #tpu.memory_space<vmem>>, %arg5: memref<2x128xf32, #tpu.memory_space<vmem>>) attributes {dimension_semantics = [#tpu.dimension_semantics<arbitrary>], iteration_bounds = array<i64: 1>, scalar_prefetch = 0 : i64, scratch_operands = 0 : i64, tpu.core_type = #tpu.core_type<tc>, window_params = [{pipeline_mode = #tpu.pipeline_mode<synchronous>, transform_indices = @transform_0, window_bounds = array<i64: 32, 32>}, {pipeline_mode = #tpu.pipeline_mode<synchronous>, transform_indices = @transform_1, window_bounds = array<i64: 2, 32>}, {pipeline_mode = #tpu.pipeline_mode<synchronous>, transform_indices = @transform_2, window_bounds = array<i64: 32, 128>}, {pipeline_mode = #tpu.pipeline_mode<synchronous>, transform_indices = @transform_3, window_bounds = array<i64: 1, 128>}, {pipeline_mode = #tpu.pipeline_mode<synchronous>, transform_indices = @transform_4, window_bounds = array<i64: 2, 128>}]} {
    %c0 = arith.constant 0 : index
    %c0_0 = arith.constant 0 : index
    %0 = vector.load %arg2[%c0, %c0_0] : memref<2x32xf32, #tpu.memory_space<vmem>>, vector<2x32xf32>
    %c0_1 = arith.constant 0 : index
    %c0_2 = arith.constant 0 : index
    %1 = vector.load %arg1[%c0_1, %c0_2] : memref<32x32xf32, #tpu.memory_space<vmem>>, vector<32x32xf32>
    %cst = arith.constant dense<0.000000e+00> : vector<2x32xf32>
    %2 = tpu.matmul %0, %1, %cst {dimension_numbers = #tpu.dot_dimension_numbers<[1], [0], [0], [1], [0, 0, 1, 1], [], []>} : vector<2x32xf32>, vector<32x32xf32>, vector<2x32xf32> -> vector<2x32xf32>
    %c0_3 = arith.constant 0 : index
    %c0_4 = arith.constant 0 : index
    %3 = vector.load %arg3[%c0_3, %c0_4] : memref<32x128xf32, #tpu.memory_space<vmem>>, vector<32x128xf32>
    %cst_5 = arith.constant dense<0.000000e+00> : vector<2x128xf32>
    %4 = tpu.matmul %2, %3, %cst_5 {dimension_numbers = #tpu.dot_dimension_numbers<[1], [0], [0], [1], [0, 0, 1, 1], [], []>} : vector<2x32xf32>, vector<32x128xf32>, vector<2x128xf32> -> vector<2x128xf32>
    %c0_6 = arith.constant 0 : index
    %c0_7 = arith.constant 0 : index
    %5 = vector.load %arg4[%c0_6, %c0_7] : memref<1x128xf32, #tpu.memory_space<vmem>>, vector<1x128xf32>
    %6 = vector.broadcast %5 : vector<1x128xf32> to vector<2x128xf32>
    %7 = arith.addf %4, %6 : vector<2x128xf32>
    %c0_8 = arith.constant 0 : index
    %c0_9 = arith.constant 0 : index
    %8 = vector.load %arg5[%c0_8, %c0_9] : memref<2x128xf32, #tpu.memory_space<vmem>>, vector<2x128xf32>
    tpu.vector_store %arg5[%c0_8, %c0_9], %7 {strides = array<i32>} : memref<2x128xf32, #tpu.memory_space<vmem>>, vector<2x128xf32>,
    return
  }
  func.func @transform_0(%arg0: i32) -> (i32, i32) {
    %c0_i32 = arith.constant 0 : i32
    %c0_i32_0 = arith.constant 0 : i32
    %c0_i32_1 = arith.constant 0 : i32
    return %c0_i32, %c0_i32_0 : i32, i32
  }
  func.func @transform_1(%arg0: i32) -> (i32, i32) {
    %c0_i32 = arith.constant 0 : i32
    %c0_i32_0 = arith.constant 0 : i32
    %c0_i32_1 = arith.constant 0 : i32
    return %c0_i32, %c0_i32_0 : i32, i32
  }
  func.func @transform_2(%arg0: i32) -> (i32, i32) {
    %c0_i32 = arith.constant 0 : i32
    %c0_i32_0 = arith.constant 0 : i32
    %c0_i32_1 = arith.constant 0 : i32
    return %c0_i32, %c0_i32_0 : i32, i32
  }
  func.func @transform_3(%arg0: i32) -> (i32, i32) {
    %c0_i32 = arith.constant 0 : i32
    %c0_i32_0 = arith.constant 0 : i32
    %c0_i32_1 = arith.constant 0 : i32
    return %c0_i32, %c0_i32_0 : i32, i32
  }
  func.func @transform_4(%arg0: i32) -> (i32, i32) {
    %c0_i32 = arith.constant 0 : i32
    %c0_i32_0 = arith.constant 0 : i32
    %c0_i32_1 = arith.constant 0 : i32
    return %c0_i32, %c0_i32_0 : i32, i32
  }
}

</mosaic_0001>

<bundles_post_ra>
// kernel: classifier_forward.1
= control target key start
LH: loop header
LB: loop body
LE: loop exit
PB: predicated region body
PF: predicated region fallthrough
CT: control target
= control target key end

     0   :  { %v271_v3 = vmov 0.0|0.0   ;;  %vm272_vm0 = vmmov 0   ;;  %v273_v6 = vmov 0.0   ;;  %s342_s0 = inlined_call_operand.vmem [shape: f32[32,32], index: 0, kind: input, shape index: {}]   ;;  %s343_s1 = inlined_call_operand.vmem [shape: f32[2,32], index: 1, kind: input, shape index: {}]   ;;  %s344_s2 = inlined_call_operand.vmem [shape: f32[32,128], index: 2, kind: input, shape index: {}]   ;;  %s345_s3 = inlined_call_operand.vmem [shape: f32[1,128], index: 3, kind: input, shape index: {}]   ;;  %s346_s4 = inlined_call_operand.hbm [shape: f32[2,128], index: 4, kind: output, shape index: {}]  }
   0x1   :  { %v19_v0 = vld [vmem:[%s342_s0] sm:$0xff]  ;;  %v20_v1 = vld [vmem:[%s342_s0 + $0x8] sm:$0xff]  ;;  %v21_v2 = vld [vmem:[%s342_s0 + $0x10] sm:$0xff]  ;;  %231 = vmatprep.subr.bf16.mxu0 %v271_v3  ;;  %217 = vmatprep.mubr.msk.f32.mxu0 %vm272_vm0, %v273_v6 }
   0x2   :  { %v232_v4 = vpack.c.bf16 %v20_v1, %v19_v0  ;;  %v22_v5 = vld [vmem:[%s342_s0 + $0x18] sm:$0xff]  ;;  %v97_v7 = vld [vmem:[%s344_s2] sm:$0xff]  ;;  %237 = vmatprep.subr.bf16.mxu1 %v271_v3  ;;  %v98_v8 = vld [vmem:[%s344_s2 + $0x8] sm:$0xff]  ;;  %228 = vmatprep.mubr.msk.f32.mxu1 %vm272_vm0, %v273_v6 }
   0x3   :  { %v99_v9 = vld [vmem:[%s344_s2 + $0x10] sm:$0xff]  ;;  %v100_v10 = vld [vmem:[%s344_s2 + $0x18] sm:$0xff]  ;;  %v235_v11 = vpack.c.bf16 %v22_v5, %v21_v2  ;;  %v238_v12 = vpack.c.bf16 %v98_v8, %v97_v7 }
   0x4   :  { %233 = vmatpush3.bf16.msra.mxu0 %v232_v4 }
   0x5   :  { %9 = vsyncpa [#allocation3], 0  ;;  %234 = vmatprep.subr.bf16.mxu0 %v271_v3  ;;  %239 = vmatpush3.bf16.msra.mxu1 %v238_v12  ;;  %v241_v13 = vpack.c.bf16 %v100_v10, %v99_v9  ;;  %v18_v14 = vld [vmem:[%s343_s1] sm:$0x3]  ;;  %vm23_vm1 = vcmask 261120   ;;  %s274_s7 = smov [#allocation2]  }
   0x6   :  { %240 = vmatprep.subr.bf16.mxu1 %v271_v3  ;;  %v197_v17 = vld [vmem:[%s345_s3] ss:$0 sm:$0xff]  ;;  %s188_s8 = sshll.u32 %s274_s7, 4  ;;  %s189_s8 = int_to_ptr.vmem [resolvable:$true] %s188_s8 }
   0x7   :  { %s247_s9 = scalar_lea.vmem %s189_s8, 32  ;;  %p252_p1 = scmp.lt.s32.totalorder %s189_s8, %s189_s8 }
   0x8   :  { %236 = vmatpush3.bf16.msra.mxu0 %v235_v11  ;;  %p248_p0 = scmp.ne.s32.totalorder %s189_s8, %s247_s9  ;;  %p253_p2 = scmp.lt.s32.totalorder %s247_s9, %s247_s9 }
   0x9   :  { %242 = vmatpush3.bf16.msra.mxu1 %v241_v13 }
   0xa   :  { %p254_p3 = por %p253_p2, %p252_p1 }
   0xb   :  { %218 = vmatmul.mubr.msk.f32.vlgmr.msra.gmra.mrb[0].mxu0 %vm23_vm1, %v18_v14 }
   0xc   :  { %p255_p4 = pnand %p254_p3, %p248_p0 }
  0xde   :  { %v93_v15 = vpop.f32.mrb[0].mxu0 }
  0xdf   :  { %v219_v16 = vpop.f32.mrb[1].mxu0  ;;  %229 = vmatmul.mubr.msk.f32.vlgmr.msra.gmra.mrb[0].mxu1 %vm23_vm1, %v93_v15 }
 0x1b2   :  { %v177_v18 = vpop.f32.mrb[0].mxu1 }
 0x1b3   :  { %v178_v19 = vadd.f32 %v197_v17, %v177_v18  ;;  %v230_v20 = vpop.f32.mrb[1].mxu1 }
 0x1b5   :  { %181 = vst [vmem:[#allocation2] sm:$0x3] %v178_v19 }
 0x1b6   :  { %258 = shalt.err (!%p255_p4)
}
 0x1b7   :  { %s259_s11 = scalar_lea.hbm %s346_s4, 32 }
 0x1b8   :  { %p260_p5 = scmp.ne.s32.totalorder %s346_s4, %s259_s11  ;;  %p263_p6 = scmp.lt.u32.totalorder %s259_s11, %s346_s4 }
 0x1ba   :  { %p265_p7 = pnand %p263_p6, %p260_p5 }
 0x1bc   :  { %268 = shalt.err (!%p265_p7)
}
 0x1bd   :  { %191 = dma.vmem_to_hbm [thread:$0]  %s189_s8, 32, %s346_s4, [#allocation3]  }
 0x1be   :  { %269 = dma.done.wait [#allocation3], 32  }
 0x1bf   :  { %270 = vsyncadd [#allocation3], 4294967264 }
 0x1c0   :  { %195 = vsyncpa [#allocation3], 1 }

</bundles_post_ra>
